<compile_context>
chip_gen: v5e
topology: v5e:2x2
jax: 0.10.0
libtpu: 0.0.40
codegen_flags: <defaults>
</compile_context>

<pallas_src>
import jax
import jax.numpy as jnp
import numpy as np
from jax.experimental import pallas as pl
from jax.experimental.pallas import tpu as pltpu


def _identity_copy_kernel(x_hbm_ref, o_hbm_ref, copy_sem):
    # Single whole-array HBM -> HBM DMA: no VMEM staging, no vld/vst traffic.
    cp = pltpu.make_async_copy(x_hbm_ref, o_hbm_ref, copy_sem)
    cp.start()
    cp.wait()


def _identity_materialize(x):
    """Produce a fresh buffer with the same contents via one HBM->HBM DMA."""
    if x.size == 0:
        # Nothing to copy; a zero-byte DMA is pointless.
        return x
    nbytes = x.size * x.dtype.itemsize
    return pl.pallas_call(
        _identity_copy_kernel,
        out_shape=jax.ShapeDtypeStruct(x.shape, x.dtype),
        in_specs=[pl.BlockSpec(memory_space=pl.ANY)],
        out_specs=pl.BlockSpec(memory_space=pl.ANY),
        scratch_shapes=[pltpu.SemaphoreType.DMA(())],
        cost_estimate=pl.CostEstimate(
            flops=0, transcendentals=0, bytes_accessed=2 * nbytes
        ),
    )(x)


def identity_forward(x, materialize=False):
    """Identity forward: returns x unchanged (same shape, dtype, values).

    By default this is a pure pass-through (zero HBM traffic), matching
    nn.Identity semantics exactly. Set materialize=True only if a distinct
    output buffer is required; that path does a single HBM->HBM DMA copy.
    """
    if not materialize:
        # Highest-value optimization: an identity op's optimal cost is zero.
        return x
    return _identity_materialize(x)


if __name__ == "__main__":
    key = jax.random.PRNGKey(0)
    # Small NCHW input consistent with typical use of Identity in a conv net.
    x = jax.random.normal(key, (2, 4, 16, 16), dtype=jnp.float32)
    expected = np.asarray(jax.device_get(x))

    # Default (zero-cost) identity path.
    y = identity_forward(x)
    jax.block_until_ready(y)
    assert y.shape == expected.shape, (y.shape, expected.shape)
    assert y.dtype == expected.dtype, (y.dtype, expected.dtype)
    assert np.array_equal(np.asarray(y), expected), "identity (pass-through) mismatch"

    # Exercise the Pallas DMA-copy kernel path once to verify it runs clean.
    y_copy = identity_forward(x, materialize=True)
    jax.block_until_ready(y_copy)
    assert y_copy.shape == expected.shape, (y_copy.shape, expected.shape)
    assert y_copy.dtype == expected.dtype, (y_copy.dtype, expected.dtype)
    assert np.array_equal(np.asarray(y_copy), expected), "identity (DMA copy) mismatch"

    print("KERNEL_OK")
</pallas_src>

<mosaic_0001>
module attributes {stable_mosaic.version = 11 : i64} {
  func.func @_identity_copy_kernel(%arg0: memref<2x4x16x16xf32, #tpu.memory_space<any>>, %arg1: memref<2x4x16x16xf32, #tpu.memory_space<any>>, %arg2: memref<!tpu.dma_semaphore, #tpu.memory_space<semaphore_mem>>) attributes {dimension_semantics = [], scalar_prefetch = 0 : i64, scratch_operands = 1 : i64, tpu.core_type = #tpu.core_type<tc>} {
    tpu.enqueue_dma source(%arg0 : memref<2x4x16x16xf32, #tpu.memory_space<any>>) target(%arg1 : memref<2x4x16x16xf32, #tpu.memory_space<any>>) target_semaphore(%arg2 : memref<!tpu.dma_semaphore, #tpu.memory_space<semaphore_mem>>)
    tpu.wait_dma2 semaphore(%arg2 : memref<!tpu.dma_semaphore, #tpu.memory_space<semaphore_mem>>) src(%arg0 : memref<2x4x16x16xf32, #tpu.memory_space<any>>) dst(%arg1 : memref<2x4x16x16xf32, #tpu.memory_space<any>>)
    return
  }
}

</mosaic_0001>

<bundles_post_ra>
// kernel: tpu_custom_call.1
= control target key start
LH: loop header
LB: loop body
LE: loop exit
PB: predicated region body
PF: predicated region fallthrough
CT: control target
= control target key end

     0   :  { %s34_s12 = smov [#allocation2]   ;;  %s35_s13 = smov [#allocation3]   ;;  %s53_s0 = inlined_call_operand.hbm [shape: f32[2,4,16,16], index: 0, kind: input, shape index: {}]   ;;  %s54_s1 = inlined_call_operand.hbm [shape: f32[2,4,16,16], index: 1, kind: output, shape index: {}]  }
   0x1   :  { %s10_s8 = sshll.u32 %s53_s0, 4  ;;  %s12_s11 = sshll.u32 %s54_s1, 4  ;;  %s11_s8 = int_to_ptr.hbm [resolvable:$true] %s10_s8  ;;  %s13_s11 = int_to_ptr.hbm [resolvable:$true] %s12_s11 }
   0x2   :  { %s36_s14 = smov 0  }
   0x3   :  { %16 = dma.general %s11_s8, 2048, %s13_s11, %s34_s12, %s35_s13, [#allocation4], %s36_s14, 0  }
   0x4   :  { %32 = dma.done.wait [#allocation2], 2048 }
   0x5   :  { %33 = vsyncadd [#allocation2], 4294965248 }
   0x6   :  { %22 = vsyncmov [#allocation2] }
   0x9   :  { %s23_s15 = vpop.sfrf %22 }
   0xa   :  { %p28_p0 = scmp.ne.s32.totalorder %s23_s15, 0 }
   0xc   :  { %27 = shalt.err (%p28_p0)  }

</bundles_post_ra>
